<compile_context>
chip_gen: v6e
topology: v6e:2x2x1
jax: 0.10.0
libtpu: 0.0.40
codegen_flags: <defaults>
</compile_context>

<pallas_src>
import numpy as np
import jax
import jax.numpy as jnp
from jax.experimental import pallas as pl
from jax.experimental.pallas import tpu as pltpu


def _round_up(x: int, m: int) -> int:
    return ((x + m - 1) // m) * m


def _mask_matrix_np(in_size: int, out_size: int, stride: int, kernel: int) -> np.ndarray:
    """M[o, i] = 1 if o*stride <= i < o*stride + kernel else 0 (exact 0/1 mask)."""
    m = np.zeros((out_size, in_size), dtype=np.float32)
    for o in range(out_size):
        m[o, o * stride: o * stride + kernel] = 1.0
    return m


def _make_fused_kernel(num_levels, c_offs, c_sizes, inv_areas):
    """Kernel refs: x0..xN-1 (C_i, H_i*W_i), pk0..pkN-1 (H_i*W_i, HoWo_pad), o (C_pad, HoWo_pad)."""
    def kernel(*refs):
        x_refs = refs[:num_levels]
        pk_refs = refs[num_levels:2 * num_levels]
        o_ref = refs[2 * num_levels]
        for x_ref, pk_ref, off, csz, inv_a in zip(x_refs, pk_refs, c_offs, c_sizes, inv_areas):
            # Single MXU matmul per level: (C_i, HW_i) @ (HW_i, HoWo_pad) -> f32 acc.
            y = jnp.dot(x_ref[...], pk_ref[...], preferred_element_type=jnp.float32)
            # Exact averaging scale applied in f32 on the VPU (free under MXU/DMA path).
            o_ref[pl.ds(off, csz), :] = (y * inv_a).astype(o_ref.dtype)
    return kernel


def pyramid_pool_agg(inputs, stride: int) -> jnp.ndarray:
    """inputs: list of (B, C_i, H_i, W_i) arrays (NCHW). Returns (B, sum C_i, H_out, W_out)."""
    B, _, H, W = inputs[-1].shape
    Ho = (H - 1) // stride + 1
    Wo = (W - 1) // stride + 1
    HoWo = Ho * Wo
    HoWo_pad = _round_up(HoWo, 128)           # lane-dense output columns

    out_dtype = inputs[-1].dtype
    mat_dtype = jnp.bfloat16 if out_dtype == jnp.bfloat16 else jnp.float32
    c_align = 16 if out_dtype == jnp.bfloat16 else 8   # sublane-aligned channel offsets

    num_levels = len(inputs)
    c_sizes = [int(x.shape[1]) for x in inputs]
    C_total = int(sum(c_sizes))

    # Sublane-aligned per-level row offsets in the fused output slab.
    c_offs = []
    off = 0
    for cs in c_sizes:
        c_offs.append(off)
        off = _round_up(off + cs, c_align)
    C_pad = off

    x_flats, pk_mats, inv_areas, in_specs = [], [], [], []
    flops = 0
    bytes_accessed = 0
    vmem_bytes = 0
    for x in inputs:
        _, C_i, H_i, W_i = x.shape
        sh, sw = H_i // Ho, W_i // Wo                      # stride_size = floor(in/out)
        kh, kw = H_i - (Ho - 1) * sh, W_i - (Wo - 1) * sw  # kernel_size
        ph = _mask_matrix_np(H_i, Ho, sh, kh)              # (Ho, H_i) 0/1
        pw = _mask_matrix_np(W_i, Wo, sw, kw)              # (Wo, W_i) 0/1
        HWi = H_i * W_i
        pk = np.zeros((HWi, HoWo_pad), dtype=np.float32)   # zero-pad cols to lane multiple
        pk[:, :HoWo] = np.kron(ph, pw).T                   # (HW_i, HoWo) 0/1 mask
        pk_mats.append(jnp.asarray(pk, dtype=mat_dtype))   # exact even in bf16
        inv_areas.append(1.0 / float(kh * kw))
        # Flatten spatial dims host-side (contiguous, free) -> plain 2-D dot in-kernel.
        x_flats.append(x.reshape(B, C_i, HWi))
        in_specs.append(pl.BlockSpec((None, C_i, HWi), lambda b: (b, 0, 0)))
        flops += 2 * B * C_i * HWi * HoWo_pad
        bytes_accessed += B * C_i * HWi * x.dtype.itemsize
        bytes_accessed += pk.size * np.dtype(mat_dtype).itemsize
        vmem_bytes += 2 * C_i * HWi * x.dtype.itemsize         # activations: double-buffered
        vmem_bytes += pk.size * np.dtype(mat_dtype).itemsize   # constants: single-buffered

    # Grid-invariant pool matrices: single-buffer them (index_map is constant).
    for pk in pk_mats:
        try:
            spec = pl.BlockSpec(pk.shape, lambda b: (0, 0), pipeline_mode=pl.Buffered(1))
        except (TypeError, AttributeError):
            spec = pl.BlockSpec(pk.shape, lambda b: (0, 0))
        in_specs.append(spec)

    bytes_accessed += B * C_total * HoWo * np.dtype(out_dtype).itemsize
    vmem_bytes += 2 * C_pad * HoWo_pad * np.dtype(out_dtype).itemsize
    # Explicit scoped-VMEM budget: actual footprint + headroom, capped at v7x physical (64 MiB).
    vmem_limit = int(min(64 << 20, max(16 << 20, 2 * vmem_bytes + (2 << 20))))

    kernel = _make_fused_kernel(num_levels, c_offs, c_sizes, inv_areas)

    out_flat = pl.pallas_call(
        kernel,
        out_shape=jax.ShapeDtypeStruct((B, C_pad, HoWo_pad), out_dtype),
        grid=(B,),
        in_specs=in_specs,
        out_specs=pl.BlockSpec((None, C_pad, HoWo_pad), lambda b: (b, 0, 0)),
        compiler_params=pltpu.CompilerParams(
            dimension_semantics=("parallel",),
            vmem_limit_bytes=vmem_limit),
        cost_estimate=pl.CostEstimate(
            flops=int(flops), transcendentals=0, bytes_accessed=int(bytes_accessed)),
    )(*x_flats, *pk_mats)

    # Strip channel-alignment and lane padding, restore NCHW.
    natural_offs = [int(v) for v in np.cumsum([0] + c_sizes)[:-1]]
    if c_offs == natural_offs:
        out = out_flat[:, :C_total, :HoWo]
    else:
        out = jnp.concatenate(
            [out_flat[:, o:o + c, :HoWo] for o, c in zip(c_offs, c_sizes)], axis=1)
    return out.reshape(B, C_total, Ho, Wo)


def _reference_pool(x, Ho, Wo):
    """Pure-JAX reference (AvgPool2d with onnx-derived kernel/stride)."""
    H, W = x.shape[-2:]
    sh, sw = H // Ho, W // Wo
    kh, kw = H - (Ho - 1) * sh, W - (Wo - 1) * sw
    s = jax.lax.reduce_window(x, 0.0, jax.lax.add,
                              (1, 1, kh, kw), (1, 1, sh, sw), 'VALID')
    return s / float(kh * kw)


if __name__ == "__main__":
    key = jax.random.PRNGKey(0)
    k1, k2, k3 = jax.random.split(key, 3)

    # Small pyramid of feature maps (B, C_i, H_i, W_i), NCHW.
    stride = 2
    x1 = jax.random.normal(k1, (2, 4, 32, 32), dtype=jnp.float32)
    x2 = jax.random.normal(k2, (2, 4, 16, 16), dtype=jnp.float32)
    x3 = jax.random.normal(k3, (2, 4, 8, 8), dtype=jnp.float32)
    inputs = [x1, x2, x3]

    out = pyramid_pool_agg(inputs, stride)
    out = jax.block_until_ready(out)

    # Correctness check against a pure-JAX reference.
    B, C, H, W = inputs[-1].shape
    Ho = (H - 1) // stride + 1
    Wo = (W - 1) // stride + 1
    ref = jnp.concatenate([_reference_pool(x, Ho, Wo) for x in inputs], axis=1)
    assert out.shape == (2, 12, Ho, Wo), out.shape
    np.testing.assert_allclose(np.asarray(out), np.asarray(ref), rtol=1e-5, atol=1e-5)

    print("KERNEL_OK")
</pallas_src>

<mosaic_0001>
module attributes {stable_mosaic.version = 11 : i64} {
  func.func @kernel(%arg0: i32, %arg1: memref<1x4x1024xf32, #tpu.memory_space<vmem>>, %arg2: memref<1x4x256xf32, #tpu.memory_space<vmem>>, %arg3: memref<1x4x64xf32, #tpu.memory_space<vmem>>, %arg4: memref<1024x128xf32, #tpu.memory_space<vmem>>, %arg5: memref<256x128xf32, #tpu.memory_space<vmem>>, %arg6: memref<64x128xf32, #tpu.memory_space<vmem>>, %arg7: memref<1x24x128xf32, #tpu.memory_space<vmem>>) attributes {dimension_semantics = [#tpu.dimension_semantics<parallel>], iteration_bounds = array<i64: 2>, scalar_prefetch = 0 : i64, scratch_operands = 0 : i64, tpu.core_type = #tpu.core_type<tc>, window_params = [{transform_indices = @transform_0, window_bounds = array<i64: 1, 4, 1024>}, {transform_indices = @transform_1, window_bounds = array<i64: 1, 4, 256>}, {transform_indices = @transform_2, window_bounds = array<i64: 1, 4, 64>}, {pipeline_mode = #tpu.pipeline_mode<synchronous>, transform_indices = @transform_3, window_bounds = array<i64: 1024, 128>}, {pipeline_mode = #tpu.pipeline_mode<synchronous>, transform_indices = @transform_4, window_bounds = array<i64: 256, 128>}, {pipeline_mode = #tpu.pipeline_mode<synchronous>, transform_indices = @transform_5, window_bounds = array<i64: 64, 128>}, {transform_indices = @transform_6, window_bounds = array<i64: 1, 24, 128>}]} {
    %c0 = arith.constant 0 : index
    %c0_0 = arith.constant 0 : index
    %c0_1 = arith.constant 0 : index
    %0 = vector.load %arg1[%c0, %c0_0, %c0_1] : memref<1x4x1024xf32, #tpu.memory_space<vmem>>, vector<1x4x1024xf32>
    %1 = vector.shape_cast %0 : vector<1x4x1024xf32> to vector<4x1024xf32>
    %c0_2 = arith.constant 0 : index
    %c0_3 = arith.constant 0 : index
    %2 = vector.load %arg4[%c0_2, %c0_3] : memref<1024x128xf32, #tpu.memory_space<vmem>>, vector<1024x128xf32>
    %cst = arith.constant dense<0.000000e+00> : vector<4x128xf32>
    %3 = tpu.matmul %1, %2, %cst {dimension_numbers = #tpu.dot_dimension_numbers<[1], [0], [0], [1], [0, 0, 1, 1], [], []>} : vector<4x1024xf32>, vector<1024x128xf32>, vector<4x128xf32> -> vector<4x128xf32>
    %cst_4 = arith.constant 1.562500e-02 : f32
    %4 = vector.broadcast %cst_4 : f32 to vector<4x128xf32>
    %5 = arith.mulf %3, %4 : vector<4x128xf32>
    %c0_5 = arith.constant 0 : index
    %c0_6 = arith.constant 0 : index
    %c0_7 = arith.constant 0 : index
    %6 = vector.load %arg7[%c0_5, %c0_6, %c0_7] : memref<1x24x128xf32, #tpu.memory_space<vmem>>, vector<1x4x128xf32>
    %7 = vector.shape_cast %6 : vector<1x4x128xf32> to vector<4x128xf32>
    %8 = vector.shape_cast %5 : vector<4x128xf32> to vector<1x4x128xf32>
    tpu.vector_store %arg7[%c0_5, %c0_6, %c0_7], %8 {strides = array<i32>} : memref<1x24x128xf32, #tpu.memory_space<vmem>>, vector<1x4x128xf32>,
    %c0_8 = arith.constant 0 : index
    %c0_9 = arith.constant 0 : index
    %c0_10 = arith.constant 0 : index
    %9 = vector.load %arg2[%c0_8, %c0_9, %c0_10] : memref<1x4x256xf32, #tpu.memory_space<vmem>>, vector<1x4x256xf32>
    %10 = vector.shape_cast %9 : vector<1x4x256xf32> to vector<4x256xf32>
    %c0_11 = arith.constant 0 : index
    %c0_12 = arith.constant 0 : index
    %11 = vector.load %arg5[%c0_11, %c0_12] : memref<256x128xf32, #tpu.memory_space<vmem>>, vector<256x128xf32>
    %cst_13 = arith.constant dense<0.000000e+00> : vector<4x128xf32>
    %12 = tpu.matmul %10, %11, %cst_13 {dimension_numbers = #tpu.dot_dimension_numbers<[1], [0], [0], [1], [0, 0, 1, 1], [], []>} : vector<4x256xf32>, vector<256x128xf32>, vector<4x128xf32> -> vector<4x128xf32>
    %cst_14 = arith.constant 6.250000e-02 : f32
    %13 = vector.broadcast %cst_14 : f32 to vector<4x128xf32>
    %14 = arith.mulf %12, %13 : vector<4x128xf32>
    %c0_15 = arith.constant 0 : index
    %c8 = arith.constant 8 : index
    %c0_16 = arith.constant 0 : index
    %15 = vector.load %arg7[%c0_15, %c8, %c0_16] : memref<1x24x128xf32, #tpu.memory_space<vmem>>, vector<1x4x128xf32>
    %16 = vector.shape_cast %15 : vector<1x4x128xf32> to vector<4x128xf32>
    %17 = vector.shape_cast %14 : vector<4x128xf32> to vector<1x4x128xf32>
    tpu.vector_store %arg7[%c0_15, %c8, %c0_16], %17 {strides = array<i32>} : memref<1x24x128xf32, #tpu.memory_space<vmem>>, vector<1x4x128xf32>,
    %c0_17 = arith.constant 0 : index
    %c0_18 = arith.constant 0 : index
    %c0_19 = arith.constant 0 : index
    %18 = vector.load %arg3[%c0_17, %c0_18, %c0_19] : memref<1x4x64xf32, #tpu.memory_space<vmem>>, vector<1x4x64xf32>
    %19 = vector.shape_cast %18 : vector<1x4x64xf32> to vector<4x64xf32>
    %c0_20 = arith.constant 0 : index
    %c0_21 = arith.constant 0 : index
    %20 = vector.load %arg6[%c0_20, %c0_21] : memref<64x128xf32, #tpu.memory_space<vmem>>, vector<64x128xf32>
    %cst_22 = arith.constant dense<0.000000e+00> : vector<4x128xf32>
    %21 = tpu.matmul %19, %20, %cst_22 {dimension_numbers = #tpu.dot_dimension_numbers<[1], [0], [0], [1], [0, 0, 1, 1], [], []>} : vector<4x64xf32>, vector<64x128xf32>, vector<4x128xf32> -> vector<4x128xf32>
    %cst_23 = arith.constant 2.500000e-01 : f32
    %22 = vector.broadcast %cst_23 : f32 to vector<4x128xf32>
    %23 = arith.mulf %21, %22 : vector<4x128xf32>
    %c0_24 = arith.constant 0 : index
    %c16 = arith.constant 16 : index
    %c0_25 = arith.constant 0 : index
    %24 = vector.load %arg7[%c0_24, %c16, %c0_25] : memref<1x24x128xf32, #tpu.memory_space<vmem>>, vector<1x4x128xf32>
    %25 = vector.shape_cast %24 : vector<1x4x128xf32> to vector<4x128xf32>
    %26 = vector.shape_cast %23 : vector<4x128xf32> to vector<1x4x128xf32>
    tpu.vector_store %arg7[%c0_24, %c16, %c0_25], %26 {strides = array<i32>} : memref<1x24x128xf32, #tpu.memory_space<vmem>>, vector<1x4x128xf32>,
    return
  }
  func.func @transform_0(%arg0: i32) -> (i32, i32, i32) {
    %c0_i32 = arith.constant 0 : i32
    %c0_i32_0 = arith.constant 0 : i32
    %c0_i32_1 = arith.constant 0 : i32
    return %arg0, %c0_i32, %c0_i32_0 : i32, i32, i32
  }
  func.func @transform_1(%arg0: i32) -> (i32, i32, i32) {
    %c0_i32 = arith.constant 0 : i32
    %c0_i32_0 = arith.constant 0 : i32
    %c0_i32_1 = arith.constant 0 : i32
    return %arg0, %c0_i32, %c0_i32_0 : i32, i32, i32
  }
  func.func @transform_2(%arg0: i32) -> (i32, i32, i32) {
    %c0_i32 = arith.constant 0 : i32
    %c0_i32_0 = arith.constant 0 : i32
    %c0_i32_1 = arith.constant 0 : i32
    return %arg0, %c0_i32, %c0_i32_0 : i32, i32, i32
  }
  func.func @transform_3(%arg0: i32) -> (i32, i32) {
    %c0_i32 = arith.constant 0 : i32
    %c0_i32_0 = arith.constant 0 : i32
    %c0_i32_1 = arith.constant 0 : i32
    return %c0_i32, %c0_i32_0 : i32, i32
  }
  func.func @transform_4(%arg0: i32) -> (i32, i32) {
    %c0_i32 = arith.constant 0 : i32
    %c0_i32_0 = arith.constant 0 : i32
    %c0_i32_1 = arith.constant 0 : i32
    return %c0_i32, %c0_i32_0 : i32, i32
  }
  func.func @transform_5(%arg0: i32) -> (i32, i32) {
    %c0_i32 = arith.constant 0 : i32
    %c0_i32_0 = arith.constant 0 : i32
    %c0_i32_1 = arith.constant 0 : i32
    return %c0_i32, %c0_i32_0 : i32, i32
  }
  func.func @transform_6(%arg0: i32) -> (i32, i32, i32) {
    %c0_i32 = arith.constant 0 : i32
    %c0_i32_0 = arith.constant 0 : i32
    %c0_i32_1 = arith.constant 0 : i32
    return %arg0, %c0_i32, %c0_i32_0 : i32, i32, i32
  }
}

</mosaic_0001>

<bundles_post_ra>
// kernel: tpu_custom_call.1
= control target key start
LH: loop header
LB: loop body
LE: loop exit
PB: predicated region body
PF: predicated region fallthrough
CT: control target
= control target key end

     0   :  { %s2066_s0 = inlined_call_operand.hbm [shape: f32[2,4,1024], index: 0, kind: input, shape index: {}]   ;;  %s2067_s1 = inlined_call_operand.hbm [shape: f32[2,4,256], index: 1, kind: input, shape index: {}]   ;;  %s2068_s2 = inlined_call_operand.hbm [shape: f32[2,4,64], index: 2, kind: input, shape index: {}]   ;;  %s2069_s3 = inlined_call_operand.hbm [shape: f32[1024,128], index: 3, kind: input, shape index: {}]   ;;  %s2070_s4 = inlined_call_operand.hbm [shape: f32[256,128], index: 4, kind: input, shape index: {}]   ;;  %s2071_s5 = inlined_call_operand.hbm [shape: f32[64,128], index: 5, kind: input, shape index: {}]   ;;  %s2072_s6 = inlined_call_operand.hbm [shape: f32[2,24,128], index: 6, kind: output, shape index: {}]  }
   0x1   :  { %2087 = sst [smem:[#allocation22_spill]] %s2066_s0 }
   0x2   :  { %2088 = sst [smem:[#allocation23_spill]] %s2067_s1 }
   0x3   :  { %2089 = sst [smem:[#allocation24_spill]] %s2069_s3 }
   0x4   :  { %11 = vsyncpa [#allocation3], 0 }
   0x5   :  { %13 = vsyncpa [#allocation3 + $0x1], 0 }
   0x6   :  { %14 = vsyncpa [#allocation6], 0 }
   0x7   :  { %16 = vsyncpa [#allocation6 + $0x1], 0 }
   0x8   :  { %17 = vsyncpa [#allocation9], 0 }
   0x9   :  { %18 = vsyncpa [#allocation12], 0 }
   0xa   :  { %19 = vsyncpa [#allocation4], 0 }
   0xb   :  { %21 = vsyncpa [#allocation4 + $0x1], 0  ;;  %s1780_s21 = smov 0   ;;  %s1782_s22 = smov 0  }
   0xc   :  { %s1784_s23 = smov 0   ;;  %s1786_s24 = smov 0  }
   0xd LB: > { %2090 = sst [smem:[#allocation19_spill]] %s1726_s23  ;;  %s1801_s25 = sadd.s32 4294967295, %s1730_s24   ;;  %s1730_s24 = sphi %s1786_s24, %s2117_s24   ;;  %s1726_s23 = sphi %s1784_s23, %s2119_s23   ;;  %s1722_s22 = sphi %s1782_s22, %s2121_s22   ;;  %s1718_s21 = sphi %s1780_s21, %s2120_s21  }
   0xe   : > { %s1162_s26 = sadd.s32 4294967294, %s1730_s24   ;;  %p47_p0 = scmp.ne.s32.totalorder %s1722_s22, %s1718_s21 }
   0xf   : > { %p2077_p1 = scmp.eq.s32.totalorder %s1801_s25, 0  ;;  %p186_p2 = scmp.eq.s32.totalorder %s1801_s25, 1 }
  0x10   : > { %p192_p3 = scmp.eq.s32.totalorder %s1162_s26, 1  ;;  %p1163_p5 = scmp.ge.s32.totalorder %s1730_s24, 1 }
  0x11   : > { %p1810_p4 = por %p2077_p1, %p47_p0  ;;  %p199_p7 = scmp.lt.s32.totalorder %s1730_s24, 3 }
  0x12   : > { %p1815_p6 = por %p192_p3, %p47_p0  ;;  %s1732_s30 = smov [#allocation8]  }
  0x13   : > { %s2091_s27 = scalar_select %p1810_p4, 1, 0 }
  0x14   : > { %s2092_s28 = scalar_select %p1815_p6, 1, 0 }
  0x15   : > { %p1820_p8 = pnand %p1163_p5, %p199_p7  ;;  %s211_s7 = sshll.u32 %s1732_s30, 4  ;;  %s212_s7 = int_to_ptr.vmem [resolvable:$true] %s211_s7 }
  0x16   : > { %s1834_s9 = sadd.s32 1, %s1730_s24   ;;  %s34_s10 = sadd.s32 1, %s1726_s23 }
  0x17   : > { %s2093_s29 = scalar_select %p1820_p8, 1, 0 }
  0x18   : > { %p1414_p9 = pneg %p1820_p8  ;;  %2095 = sst [smem:[#allocation20_spill]] %s1834_s9 }
  0x19   : > { %s31_s11 = ssub.s32 %s1730_s24, %s1834_s9  ;;  %s1503_s12 = scalar_lea.vmem %s212_s7, 16384 }
  0x1a   : > { %p1829_p11 = pnand %p1414_p9, %p2077_p1  ;;  %p1504_p13 = scmp.ne.s32.totalorder %s212_s7, %s1503_s12 }
  0x1b   : > { %p1511_p5 = scmp.lt.s32.totalorder %s212_s7, %s212_s7  ;;  %p1512_p7 = scmp.lt.s32.totalorder %s1503_s12, %s1503_s12 }
  0x1c   : > { %s2094_s8 = scalar_select %p1829_p11, 1, 0 }
  0x1d   : > { %p2078_p12 = pneg %p1829_p11  ;;  %p1513_p9 = por %p1512_p7, %p1511_p5 }
  0x1f   : > { %p1506_p0 = pnand %p1504_p13, %p2078_p12 }
  0x21   : > { %p1507_p3 = pneg %p1506_p0 }
  0x23   : > { %p1514_p10 = pnand %p1513_p9, %p1507_p3 }
  0x25   : > { %1517 = shalt.err (!%p1514_p10)
}
  0x26   : > { %s2073_s13 = smov 128   ;;  %s2075_s14 = smov 8  }
  0x27   : > { %s2096_s3 = sld [smem:[#allocation24_spill]]  ;;  %p32_p10 = scmp.eq.s32.totalorder %s31_s11, 0 }
  0x28   : > { %p41_p13 = scmp.ne.s32.totalorder %s1726_s23, %s1722_s22  ;;  %p42_p0 = scmp.eq.s32.totalorder %s1730_s24, 0 }
  0x29   : > { %p1441_p3 = scmp.lt.s32.totalorder %s1730_s24, 2  ;;  %s1866_s19 = sand.u32 1, %s1726_s23  }
  0x2a   : > { %s1857_s17 = scalar_select %p32_p10, %s1726_s23, %s34_s10  }
  0x2b   : > { %p43_p5 = por %p42_p0, %p41_p13  ;;  %p1861_p7 = por %p186_p2, %p41_p13 }
  0x2c   : > { %2097 = sst [smem:[#allocation21_spill]] %s1857_s17  ;;  %s270_s20 = sand.u32 1, %s1730_s24  }
  0x2d   : > { %1417 = dma.hbm_to_vmem [thread:$0]  (!%p1829_p11), %s2096_s3, 16384, %s212_s7, [#allocation9], %s2073_s13, %s2073_s13, %s2075_s14  }
  0x2e   : > { %s2098_s18 = scalar_select %p1861_p7, 1, 0 }
  0x2f   : > { %p1869_p9 = pnand %p1441_p3, %p43_p5  ;;  %s1171_s30 = sshll.u32 %s1866_s19, 3 }
  0x30   : > { %s1188_s7 = sshll.u32 %s1730_s24, 7  ;;  %s2100_s1 = sld [smem:[#allocation23_spill]] }
  0x31   : > { %s274_s15 = scalar_lea.vmem [#allocation5], %s1171_s30  ;;  %s1880_s13 = scalar_lea.sflag [#allocation6], %s270_s20 }
  0x32   : > { %s282_s16 = sshll.u32 %s274_s15, 4  ;;  %p1886_p10 = pneg %p1869_p9  ;;  %s283_s16 = int_to_ptr.vmem [resolvable:$true] %s282_s16 }
  0x36   : > { %s1878_s12 = scalar_lea.hbm %s2100_s1, %s1188_s7  ;;  %s1523_s10 = scalar_lea.hbm %s2100_s1, 256 }
  0x37   : > { %s1518_s14 = scalar_lea.hbm %s1878_s12, 128  ;;  %p1524_p3 = scmp.lt.s32.totalorder %s1878_s12, %s2100_s1 }
  0x38   : > { %p1519_p2 = scmp.ne.s32.totalorder %s1878_s12, %s1518_s14  ;;  %p1525_p5 = scmp.lt.s32.totalorder %s1523_s10, %s1518_s14 }
  0x3a   : > { %p1521_p13 = pnand %p1886_p10, %p1519_p2  ;;  %p1526_p1 = por %p1525_p5, %p1524_p3 }
  0x3c   : > { %p1522_p0 = pneg %p1521_p13 }
  0x3e   : > { %p1527_p12 = pnand %p1526_p1, %p1522_p0 }
  0x40   : > { %1530 = shalt.err (!%p1527_p12)
}
  0x41   : > { %s1531_s20 = scalar_lea.vmem %s283_s16, 128  ;;  %s1735_s17 = smov [#allocation5]  }
  0x42   : > { %p1532_p6 = scmp.ne.s32.totalorder %s283_s16, %s1531_s20  ;;  %s1536_s23 = sshll.u32 %s1735_s17, 4  ;;  %s1537_s23 = int_to_ptr.vmem [resolvable:$false] %s1536_s23 }
  0x43   : > { %s1538_s9 = scalar_lea.vmem %s1537_s23, 256  ;;  %p1539_p2 = scmp.lt.s32.totalorder %s283_s16, %s1537_s23 }
  0x44   : > { %p1534_p7 = pnand %p1532_p6, %p1886_p10  ;;  %p1540_p13 = scmp.lt.s32.totalorder %s1538_s9, %s1531_s20 }
  0x46   : > { %p1535_p4 = pneg %p1534_p7  ;;  %p1541_p8 = por %p1540_p13, %p1539_p2 }
  0x48   : > { %p1542_p11 = pnand %p1541_p8, %p1535_p4 }
  0x4a   : > { %1545 = shalt.err (!%p1542_p11)
}
  0x4b   : > { %1430 = dma.hbm_to_vmem [thread:$0]  (!%p1869_p9), %s1878_s12, 128, %s283_s16, %s1880_s13  }
  0x4c   : > { %s1736_s14 = smov [#allocation10]   ;;  %s1737_s11 = smov [#allocation11]  }
  0x4d   : > { %s224_s7 = sshll.u32 %s1736_s14, 4  ;;  %s237_s10 = sshll.u32 %s1737_s11, 4  ;;  %s225_s7 = int_to_ptr.vmem [resolvable:$true] %s224_s7  ;;  %s238_s10 = int_to_ptr.vmem [resolvable:$true] %s237_s10 }
  0x4e   : > { %s1557_s30 = scalar_lea.vmem %s225_s7, 4096  ;;  %p2102_p6 = scmp.ne.s32.totalorder %s2094_s8, 0 }
  0x4f   : > { %p1558_p1 = scmp.ne.s32.totalorder %s225_s7, %s1557_s30  ;;  %p1565_p3 = scmp.lt.s32.totalorder %s225_s7, %s225_s7 }
  0x50   : > { %p2103_p12 = pneg %p2102_p6  ;;  %p1566_p4 = scmp.lt.s32.totalorder %s1557_s30, %s1557_s30 }
  0x52   : > { %p1560_p7 = pnand %p1558_p1, %p2103_p12  ;;  %p1567_p8 = por %p1566_p4, %p1565_p3 }
  0x54   : > { %p1561_p0 = pneg %p1560_p7 }
  0x56   : > { %p1568_p11 = pnand %p1567_p8, %p1561_p0 }
  0x58   : > { %1571 = shalt.err (!%p1568_p11)
}
  0x59   : > { %s2104_s23 = smov 8   ;;  %s2105_s9 = smov 128  }
  0x5a   : > { %1420 = dma.hbm_to_vmem [thread:$0]  (!%p2102_p6), %s2070_s4, 4096, %s225_s7, [#allocation9], %s2105_s9, %s2105_s9, %s2104_s23  }
  0x5b   : > { %s1583_s16 = scalar_lea.vmem %s238_s10, 1024  ;;  %p2106_p2 = pmov %p2103_p12 }
  0x5c   : > { %p1584_p5 = scmp.ne.s32.totalorder %s238_s10, %s1583_s16  ;;  %p1591_p12 = scmp.lt.s32.totalorder %s238_s10, %s238_s10 }
  0x5d   : > { %p1592_p7 = scmp.lt.s32.totalorder %s1583_s16, %s1583_s16 }
  0x5e   : > { %p1586_p13 = pnand %p1584_p5, %p2106_p2 }
  0x5f   : > { %p1593_p0 = por %p1592_p7, %p1591_p12 }
  0x60   : > { %p1587_p1 = pneg %p1586_p13 }
  0x62   : > { %p1594_p3 = pnand %p1593_p0, %p1587_p1 }
  0x64   : > { %1597 = shalt.err (!%p1594_p3)
}
  0x65   : > { %1423 = dma.hbm_to_vmem [thread:$0]  (!%p2102_p6), %s2071_s5, 1024, %s238_s10, [#allocation12], %s2105_s9, %s2105_s9, %s2104_s23  }
  0x66   : > { %s1168_s14 = sshll.u32 %s1866_s19, 5  ;;  %s1187_s7 = sshll.u32 %s1730_s24, 9 }
  0x67   : > { %s2107_s0 = sld [smem:[#allocation22_spill]]  ;;  %s255_s8 = scalar_lea.vmem [#allocation2], %s1168_s14 }
  0x68   : > { %s263_s12 = sshll.u32 %s255_s8, 4  ;;  %s1174_s16 = sshll.u32 %s1866_s19, 2  ;;  %s264_s12 = int_to_ptr.vmem [resolvable:$true] %s263_s12 }
  0x69   : > { %s252_s15 = scalar_lea.sflag [#allocation3], %s1866_s19 }
  0x6d   : > { %s1932_s17 = scalar_lea.hbm %s2107_s0, %s1187_s7  ;;  %s1603_s9 = scalar_lea.hbm %s2107_s0, 1024 }
  0x6e   : > { %s1598_s20 = scalar_lea.hbm %s1932_s17, 512  ;;  %p1604_p11 = scmp.lt.s32.totalorder %s1932_s17, %s2107_s0 }
  0x6f   : > { %p1599_p4 = scmp.ne.s32.totalorder %s1932_s17, %s1598_s20  ;;  %p1605_p5 = scmp.lt.s32.totalorder %s1603_s9, %s1598_s20 }
  0x71   : > { %p1601_p8 = pnand %p1599_p4, %p1886_p10  ;;  %p1606_p2 = por %p1605_p5, %p1604_p11 }
  0x73   : > { %p1602_p6 = pneg %p1601_p8 }
  0x75   : > { %p1607_p13 = pnand %p1606_p2, %p1602_p6 }
  0x77   : > { %1610 = shalt.err (!%p1607_p13)
}
  0x78   : > { %s1611_s14 = scalar_lea.vmem %s264_s12, 512  ;;  %s1738_s19 = smov [#allocation2]  }
  0x79   : > { %p1612_p1 = scmp.ne.s32.totalorder %s264_s12, %s1611_s14  ;;  %s1616_s30 = sshll.u32 %s1738_s19, 4  ;;  %s1617_s30 = int_to_ptr.vmem [resolvable:$false] %s1616_s30 }
  0x7a   : > { %s1618_s8 = scalar_lea.vmem %s1617_s30, 1024  ;;  %p1619_p0 = scmp.lt.s32.totalorder %s264_s12, %s1617_s30 }
  0x7b   : > { %p1614_p12 = pnand %p1612_p1, %p1886_p10  ;;  %p1620_p3 = scmp.lt.s32.totalorder %s1618_s8, %s1611_s14 }
  0x7d   : > { %p1615_p7 = pneg %p1614_p12  ;;  %p1621_p4 = por %p1620_p3, %p1619_p0 }
  0x7f   : > { %p1622_p8 = pnand %p1621_p4, %p1615_p7 }
  0x81   : > { %1625 = shalt.err (!%p1622_p8)
}
  0x82   : > { %1427 = dma.hbm_to_vmem [thread:$0]  (!%p1869_p9), %s1932_s17, 512, %s264_s12, %s252_s15  }
  0x83   : > { %s1175_s20 = sshll.u32 %s1730_s24, 6  ;;  %s293_s10 = scalar_lea.vmem [#allocation7], %s1174_s16 }
  0x84   : > { %s300_s23 = sshll.u32 %s293_s10, 4  ;;  %s298_s7 = scalar_lea.hbm %s2068_s2, %s1175_s20  ;;  %s301_s23 = int_to_ptr.vmem [resolvable:$true] %s300_s23 }
  0x85   : > { %s1626_s19 = scalar_lea.hbm %s298_s7, 64  ;;  %s1631_s8 = scalar_lea.hbm %s2068_s2, 128 }
  0x86   : > { %p1627_p6 = scmp.ne.s32.totalorder %s298_s7, %s1626_s19  ;;  %p1632_p2 = scmp.lt.s32.totalorder %s298_s7, %s2068_s2 }
  0x87   : > { %p1633_p13 = scmp.lt.s32.totalorder %s1631_s8, %s1626_s19 }
  0x88   : > { %p1629_p11 = pnand %p1627_p6, %p1886_p10 }
  0x89   : > { %p1634_p1 = por %p1633_p13, %p1632_p2 }
  0x8a   : > { %p1630_p5 = pneg %p1629_p11 }
  0x8c   : > { %p1635_p12 = pnand %p1634_p1, %p1630_p5 }
  0x8e   : > { %1638 = shalt.err (!%p1635_p12)
}
  0x8f   : > { %s1639_s17 = scalar_lea.vmem %s301_s23, 64  ;;  %s1739_s12 = smov [#allocation7]  }
  0x90   : > { %p1640_p7 = scmp.ne.s32.totalorder %s301_s23, %s1639_s17  ;;  %s1644_s16 = sshll.u32 %s1739_s12, 4  ;;  %s1645_s16 = int_to_ptr.vmem [resolvable:$false] %s1644_s16 }
  0x91   : > { %s1646_s15 = scalar_lea.vmem %s1645_s16, 128  ;;  %p1647_p4 = scmp.lt.s32.totalorder %s301_s23, %s1645_s16 }
  0x92   : > { %p1642_p0 = pnand %p1640_p7, %p1886_p10  ;;  %p1648_p8 = scmp.lt.s32.totalorder %s1646_s15, %s1639_s17 }
  0x94   : > { %p1643_p3 = pneg %p1642_p0  ;;  %p1649_p6 = por %p1648_p8, %p1647_p4 }
  0x96   : > { %p1650_p11 = pnand %p1649_p6, %p1643_p3 }
  0x98   : > { %1653 = shalt.err (!%p1650_p11)
}
  0x99   : > { %1433 = dma.hbm_to_vmem [thread:$0]  (!%p1869_p9), %s298_s7, 64, %s301_s23, %s1880_s13  }
  0x9a   : > { %p2108_p5 = scmp.ne.s32.totalorder %s2093_s29, 0 }
  0x9b   : > { %s1972_s0 = sand.u32 (!%p2108_p5), 1, %s1722_s22   ;;  %p2109_p10 = scmp.ne.s32.totalorder (!%p2108_p5), %s2091_s27, 0 }
  0x9c   : > { %309 = sbr.rel (%p2108_p5) target bundleno = 486 (0x1e6), region = 44  ;;  %s1177_s1 = sshll.u32 (!%p2108_p5), %s1972_s0, 5 }
  0x9d   : > { %s312_s3 = scalar_lea.sflag (!%p2108_p5), [#allocation3], %s1972_s0  ;;  %s1976_s20 = scalar_lea.vmem (!%p2108_p5), [#allocation2], %s1177_s1 }
  0xa1   : > { %1697 = dma.done.wait (%p2109_p10), %s312_s3, 512  }
  0xa2   : > { %1699 = vsyncadd (%p2109_p10), %s312_s3, 4294966784  ;;  %s320_s29 = sand.u32 1, %s1801_s25   ;;  %s1178_s13 = sshll.u32 %s1972_s0, 3 }
  0xa3   : > { %s321_s26 = scalar_lea.sflag [#allocation6], %s320_s29  ;;  %s1984_s10 = scalar_lea.vmem [#allocation5], %s1178_s13 }
  0xa4   : > { %1701 = dma.done.wait (%p2109_p10), %s321_s26, 192  }
  0xa5   : > { %1703 = vsyncadd (%p2109_p10), %s321_s26, 4294967104  ;;  %s1179_s23 = sshll.u32 %s1972_s0, 2  ;;  %p2110_p9 = scmp.eq.s32.totalorder %s1801_s25, 0 }
  0xa6   : > { %s1991_s9 = scalar_lea.vmem [#allocation7], %s1179_s23 }
  0xa7   : > { %1705 = dma.done.wait (%p2110_p9), [#allocation9], 20480   ;;  %p2111_p2 = pmov %p2110_p9 }
  0xa9   : > { %1707 = vsyncadd (%p2111_p2), [#allocation9], 4294946816  ;;  %p2112_p13 = pmov %p2111_p2 }
  0xaa   : > { %p2113_p1 = pmov %p2111_p2 }
  0xab   : > { %1709 = dma.done.wait (%p2112_p13), [#allocation12], 1024  }
  0xac   : > { %1711 = vsyncadd (%p2113_p1), [#allocation12], 4294966272  ;;  %v419_v0 = vld [vmem:[#allocation8 + $0xf8] sm:$0xff]  ;;  %v418_v4 = vld [vmem:[#allocation8 + $0xf0] sm:$0xff]  ;;  %vm927_vm0 = vcmask 523264   ;;  %vm1741_vm1 = vmmov 0  }
  0xad   : > { %v451_v1 = vld [vmem:[#allocation8 + $0x1f8] sm:$0xff]  ;;  %1189 = vmatprep.subr.mxu0 %v419_v0  ;;  %v450_v5 = vld [vmem:[#allocation8 + $0x1f0] sm:$0xff]  ;;  %v417_v8 = vld [vmem:[#allocation8 + $0xe8] sm:$0xff]  ;;  %s1392_s27 = smul.u32 24, %s1972_s0  ;;  %s1004_s17 = scalar_lea.sflag [#allocation4], %s1972_s0 }
  0xae   : > { %v403_v2 = vld [vmem:[#allocation8 + $0x78] sm:$0xff]  ;;  %1224 = vmatprep.subr.mxu1 %v451_v1  ;;  %v402_v6 = vld [vmem:[#allocation8 + $0x70] sm:$0xff]  ;;  %v449_v9 = vld [vmem:[#allocation8 + $0x1e8] sm:$0xff]  ;;  %s1393_s19 = smul.u32 384, %s1801_s25  ;;  %p2114_p7 = scmp.ne.s32.totalorder %s2098_s18, 0 }
  0xaf   : > { %v435_v3 = vld [vmem:[#allocation8 + $0x178] sm:$0xff]  ;;  %1190 = vmatpush3.msra.mxu0 %v403_v2  ;;  %v434_v7 = vld [vmem:[#allocation8 + $0x170] sm:$0xff]  ;;  %v401_v10 = vld [vmem:[#allocation8 + $0x68] sm:$0xff]  ;;  %s383_s11 = scalar_lea.vmem [#allocation13], %s1392_s27  ;;  %s1742_s25 = smov [#allocation13]  }
  0xb0   : > { %1225 = vmatpush3.msra.mxu1 %v435_v3  ;;  %1191 = vmatprep.subr.mxu0 %v418_v4  ;;  %v433_v11 = vld [vmem:[#allocation8 + $0x168] sm:$0xff]  ;;  %v416_v12 = vld [vmem:[#allocation8 + $0xe0] sm:$0xff]  ;;  %v415_v16 = vld [vmem:[#allocation8 + $0xd8] sm:$0xff]  ;;  %s1017_s7 = sshll.u32 %s383_s11, 4  ;;  %s2023_s8 = scalar_lea.hbm %s2072_s6, %s1393_s19  ;;  %s2018_s7 = int_to_ptr.vmem [resolvable:$true] %s1017_s7 }
  0xb1   : > { %1226 = vmatprep.subr.mxu1 %v450_v5  ;;  %1192 = vmatpush3.msra.mxu0 %v402_v6  ;;  %v448_v13 = vld [vmem:[#allocation8 + $0x1e0] sm:$0xff]  ;;  %v447_v17 = vld [vmem:[#allocation8 + $0x1d8] sm:$0xff]  ;;  %v414_v20 = vld [vmem:[#allocation8 + $0xd0] sm:$0xff]  ;;  %s1654_s12 = scalar_lea.vmem %s2018_s7, 384  ;;  %s1658_s16 = sshll.u32 %s1742_s25, 4  ;;  %s1659_s16 = int_to_ptr.vmem [resolvable:$false] %s1658_s16 }
  0xb2   : > { %1227 = vmatpush3.msra.mxu1 %v434_v7  ;;  %1193 = vmatprep.subr.mxu0 %v417_v8  ;;  %v400_v14 = vld [vmem:[#allocation8 + $0x60] sm:$0xff]  ;;  %v399_v18 = vld [vmem:[#allocation8 + $0x58] sm:$0xff]  ;;  %v446_v21 = vld [vmem:[#allocation8 + $0x1d0] sm:$0xff]  ;;  %p1655_p12 = scmp.ne.s32.totalorder %s2018_s7, %s1654_s12  ;;  %s1660_s15 = scalar_lea.vmem %s1659_s16, 768 }
  0xb3   : > { %1228 = vmatprep.subr.mxu1 %v449_v9  ;;  %v432_v15 = vld [vmem:[#allocation8 + $0x160] sm:$0xff]  ;;  %1194 = vmatpush3.msra.mxu0 %v401_v10  ;;  %v431_v19 = vld [vmem:[#allocation8 + $0x158] sm:$0xff]  ;;  %v398_v22 = vld [vmem:[#allocation8 + $0x50] sm:$0xff]  ;;  %p1661_p4 = scmp.lt.s32.totalorder %s2018_s7, %s1659_s16  ;;  %p1662_p8 = scmp.lt.s32.totalorder %s1660_s15, %s1654_s12 }
  0xb4   : > { %1229 = vmatpush3.msra.mxu1 %v433_v11  ;;  %1195 = vmatprep.subr.mxu0 %v416_v12  ;;  %v430_v23 = vld [vmem:[#allocation8 + $0x150] sm:$0xff]  ;;  %v413_v24 = vld [vmem:[#allocation8 + $0xc8] sm:$0xff]  ;;  %v412_v28 = vld [vmem:[#allocation8 + $0xc0] sm:$0xff]  ;;  %p1656_p0 = pnand %p1655_p12, %p2114_p7 }
  0xb5   : > { %1230 = vmatprep.subr.mxu1 %v448_v13  ;;  %1196 = vmatpush3.msra.mxu0 %v400_v14  ;;  %v445_v25 = vld [vmem:[#allocation8 + $0x1c8] sm:$0xff]  ;;  %v444_v29 = vld [vmem:[#allocation8 + $0x1c0] sm:$0xff]  ;;  %v411_v32 = vld [vmem:[#allocation8 + $0xb8] sm:$0xff]  ;;  %p1663_p6 = por %p1662_p8, %p1661_p4 }
  0xb6   : > { %1231 = vmatpush3.msra.mxu1 %v432_v15  ;;  %1197 = vmatprep.subr.mxu0 %v415_v16  ;;  %v397_v26 = vld [vmem:[#allocation8 + $0x48] sm:$0xff]  ;;  %v396_v30 = vld [vmem:[#allocation8 + $0x40] sm:$0xff]  ;;  %v443_v33 = vld [vmem:[#allocation8 + $0x1b8] sm:$0xff]  ;;  %p1657_p3 = pneg %p1656_p0 }
  0xb7   : > { %1232 = vmatprep.subr.mxu1 %v447_v17  ;;  %1198 = vmatpush3.msra.mxu0 %v399_v18  ;;  %v429_v27 = vld [vmem:[#allocation8 + $0x148] sm:$0xff]  ;;  %v428_v31 = vld [vmem:[#allocation8 + $0x140] sm:$0xff]  ;;  %v395_v34 = vld [vmem:[#allocation8 + $0x38] sm:$0xff] }
  0xb8   : > { %1233 = vmatpush3.msra.mxu1 %v431_v19  ;;  %1199 = vmatprep.subr.mxu0 %v414_v20  ;;  %v427_v35 = vld [vmem:[#allocation8 + $0x138] sm:$0xff]  ;;  %v410_v36 = vld [vmem:[#allocation8 + $0xb0] sm:$0xff]  ;;  %v409_v40 = vld [vmem:[#allocation8 + $0xa8] sm:$0xff]  ;;  %p1664_p11 = pnand %p1663_p6, %p1657_p3 }
  0xb9   : > { %1234 = vmatprep.subr.mxu1 %v446_v21  ;;  %1200 = vmatpush3.msra.mxu0 %v398_v22  ;;  %v442_v37 = vld [vmem:[#allocation8 + $0x1b0] sm:$0xff]  ;;  %v441_v41 = vld [vmem:[#allocation8 + $0x1a8] sm:$0xff]  ;;  %v408_v44 = vld [vmem:[#allocation8 + $0xa0] sm:$0xff] }
  0xba   : > { %1235 = vmatpush3.msra.mxu1 %v430_v23  ;;  %1201 = vmatprep.subr.mxu0 %v413_v24  ;;  %v394_v38 = vld [vmem:[#allocation8 + $0x30] sm:$0xff]  ;;  %v393_v42 = vld [vmem:[#allocation8 + $0x28] sm:$0xff]  ;;  %v440_v45 = vld [vmem:[#allocation8 + $0x1a0] sm:$0xff] }
  0xbb   : > { %1236 = vmatprep.subr.mxu1 %v445_v25  ;;  %1202 = vmatpush3.msra.mxu0 %v397_v26  ;;  %v426_v39 = vld [vmem:[#allocation8 + $0x130] sm:$0xff]  ;;  %v425_v43 = vld [vmem:[#allocation8 + $0x128] sm:$0xff]  ;;  %v392_v46 = vld [vmem:[#allocation8 + $0x20] sm:$0xff] }
  0xbc   : > { %1237 = vmatpush3.msra.mxu1 %v429_v27  ;;  %1203 = vmatprep.subr.mxu0 %v412_v28  ;;  %v424_v47 = vld [vmem:[#allocation8 + $0x120] sm:$0xff]  ;;  %v407_v48 = vld [vmem:[#allocation8 + $0x98] sm:$0xff]  ;;  %v406_v52 = vld [vmem:[#allocation8 + $0x90] sm:$0xff] }
  0xbd   : > { %1238 = vmatprep.subr.mxu1 %v444_v29  ;;  %1204 = vmatpush3.msra.mxu0 %v396_v30  ;;  %v439_v49 = vld [vmem:[#allocation8 + $0x198] sm:$0xff]  ;;  %v438_v53 = vld [vmem:[#allocation8 + $0x190] sm:$0xff]  ;;  %v384_v56 = vld [vmem:[%s1976_s20] sm:$0xff] }
  0xbe   : > { %1239 = vmatpush3.msra.mxu1 %v428_v31  ;;  %1205 = vmatprep.subr.mxu0 %v411_v32  ;;  %v391_v50 = vld [vmem:[#allocation8 + $0x18] sm:$0xff]  ;;  %v390_v54 = vld [vmem:[#allocation8 + $0x10] sm:$0xff]  ;;  %v405_v57 = vld [vmem:[#allocation8 + $0x88] sm:$0xff]  ;;  %v520_v0 = vcombine.high %v384_v56, %v384_v56 }
  0xbf   : > { %1240 = vmatprep.subr.mxu1 %v443_v33  ;;  %1206 = vmatpush3.msra.mxu0 %v395_v34  ;;  %v423_v51 = vld [vmem:[#allocation8 + $0x118] sm:$0xff]  ;;  %v422_v55 = vld [vmem:[#allocation8 + $0x110] sm:$0xff]  ;;  %v437_v58 = vld [vmem:[#allocation8 + $0x188] sm:$0xff] }
  0xc0   : > { %1241 = vmatpush3.msra.mxu1 %v427_v35  ;;  %1207 = vmatprep.subr.mxu0 %v410_v36  ;;  %v385_v59 = vld [vmem:[%s1976_s20 + $0x8] sm:$0xff]  ;;  %v389_v60 = vld [vmem:[#allocation8 + $0x8] sm:$0xff]  ;;  %v404_v62 = vld [vmem:[#allocation8 + $0x80] sm:$0xff] }
  0xc1   : > { %1242 = vmatprep.subr.mxu1 %v442_v37  ;;  %1208 = vmatpush3.msra.mxu0 %v394_v38  ;;  %v421_v61 = vld [vmem:[#allocation8 + $0x108] sm:$0xff]  ;;  %v436_v63 = vld [vmem:[#allocation8 + $0x180] sm:$0xff]  ;;  %v521_v2 = vcombine.high %v385_v59, %v385_v59  ;;  %v483_v4 = vld [vmem:[#allocation8 + $0x2f8] sm:$0xff] }
  0xc2   : > { %1243 = vmatpush3.msra.mxu1 %v426_v39  ;;  %1209 = vmatprep.subr.mxu0 %v409_v40  ;;  %v388_v1 = vld [vmem:[#allocation8] sm:$0xff]  ;;  %v515_v5 = vld [vmem:[#allocation8 + $0x3f8] sm:$0xff]  ;;  %v482_v8 = vld [vmem:[#allocation8 + $0x2f0] sm:$0xff] }
  0xc3   : > { %1244 = vmatprep.subr.mxu1 %v441_v41  ;;  %1210 = vmatpush3.msra.mxu0 %v393_v42  ;;  %v420_v3 = vld [vmem:[#allocation8 + $0x100] sm:$0xff]  ;;  %v467_v6 = vld [vmem:[#allocation8 + $0x278] sm:$0xff]  ;;  %v514_v9 = vld [vmem:[#allocation8 + $0x3f0] sm:$0xff] }
  0xc4   : > { %1245 = vmatpush3.msra.mxu1 %v425_v43  ;;  %1211 = vmatprep.subr.mxu0 %v408_v44  ;;  %v499_v7 = vld [vmem:[#allocation8 + $0x378] sm:$0xff]  ;;  %v466_v10 = vld [vmem:[#allocation8 + $0x270] sm:$0xff]  ;;  %v481_v12 = vld [vmem:[#allocation8 + $0x2e8] sm:$0xff] }
  0xc5   : > { %1246 = vmatprep.subr.mxu1 %v440_v45  ;;  %1212 = vmatpush3.msra.mxu0 %v392_v46  ;;  %v498_v11 = vld [vmem:[#allocation8 + $0x370] sm:$0xff]  ;;  %v513_v13 = vld [vmem:[#allocation8 + $0x3e8] sm:$0xff]  ;;  %v480_v16 = vld [vmem:[#allocation8 + $0x2e0] sm:$0xff] }
  0xc6   : > { %1247 = vmatpush3.msra.mxu1 %v424_v47  ;;  %1213 = vmatprep.subr.mxu0 %v407_v48  ;;  %v465_v14 = vld [vmem:[#allocation8 + $0x268] sm:$0xff]  ;;  %v512_v17 = vld [vmem:[#allocation8 + $0x3e0] sm:$0xff]  ;;  %v479_v20 = vld [vmem:[#allocation8 + $0x2d8] sm:$0xff] }
  0xc7   : > { %1248 = vmatprep.subr.mxu1 %v439_v49  ;;  %1214 = vmatpush3.msra.mxu0 %v391_v50  ;;  %v497_v15 = vld [vmem:[#allocation8 + $0x368] sm:$0xff]  ;;  %v464_v18 = vld [vmem:[#allocation8 + $0x260] sm:$0xff]  ;;  %v511_v21 = vld [vmem:[#allocation8 + $0x3d8] sm:$0xff] }
  0xc8   : > { %1249 = vmatpush3.msra.mxu1 %v423_v51  ;;  %1215 = vmatprep.subr.mxu0 %v406_v52  ;;  %v496_v19 = vld [vmem:[#allocation8 + $0x360] sm:$0xff]  ;;  %v463_v22 = vld [vmem:[#allocation8 + $0x258] sm:$0xff]  ;;  %v478_v24 = vld [vmem:[#allocation8 + $0x2d0] sm:$0xff] }
  0xc9   : > { %1250 = vmatprep.subr.mxu1 %v438_v53  ;;  %1216 = vmatpush3.msra.mxu0 %v390_v54  ;;  %v495_v23 = vld [vmem:[#allocation8 + $0x358] sm:$0xff]  ;;  %v510_v25 = vld [vmem:[#allocation8 + $0x3d0] sm:$0xff]  ;;  %v477_v28 = vld [vmem:[#allocation8 + $0x2c8] sm:$0xff] }
  0xca   : > { %1251 = vmatpush3.msra.mxu1 %v422_v55  ;;  %1217 = vmatprep.subr.mxu0 %v405_v57  ;;  %v462_v26 = vld [vmem:[#allocation8 + $0x250] sm:$0xff]  ;;  %v509_v29 = vld [vmem:[#allocation8 + $0x3c8] sm:$0xff]  ;;  %v476_v32 = vld [vmem:[#allocation8 + $0x2c0] sm:$0xff] }
  0xcb   : > { %1252 = vmatprep.subr.mxu1 %v437_v58  ;;  %1218 = vmatpush3.msra.mxu0 %v389_v60  ;;  %v494_v27 = vld [vmem:[#allocation8 + $0x350] sm:$0xff]  ;;  %v461_v30 = vld [vmem:[#allocation8 + $0x248] sm:$0xff]  ;;  %v508_v33 = vld [vmem:[#allocation8 + $0x3c0] sm:$0xff] }
  0xcc   : > { %1253 = vmatpush3.msra.mxu1 %v421_v61  ;;  %1219 = vmatprep.subr.mxu0 %v404_v62  ;;  %v493_v31 = vld [vmem:[#allocation8 + $0x348] sm:$0xff]  ;;  %v460_v34 = vld [vmem:[#allocation8 + $0x240] sm:$0xff]  ;;  %v475_v36 = vld [vmem:[#allocation8 + $0x2b8] sm:$0xff] }
  0xcd   : > { %1254 = vmatprep.subr.mxu1 %v436_v63  ;;  %1220 = vmatpush3.msra.mxu0 %v388_v1  ;;  %v492_v35 = vld [vmem:[#allocation8 + $0x340] sm:$0xff]  ;;  %v507_v37 = vld [vmem:[#allocation8 + $0x3b8] sm:$0xff]  ;;  %v474_v40 = vld [vmem:[#allocation8 + $0x2b0] sm:$0xff] }
  0xce   : > { %592 = vmatprep.mubr.f32.mxu0 %v520_v0  ;;  %1255 = vmatpush3.msra.mxu1 %v420_v3  ;;  %v459_v38 = vld [vmem:[#allocation8 + $0x238] sm:$0xff]  ;;  %v506_v41 = vld [vmem:[#allocation8 + $0x3b0] sm:$0xff]  ;;  %v473_v44 = vld [vmem:[#allocation8 + $0x2a8] sm:$0xff] }
  0xcf   : > { %662 = vmatprep.mubr.f32.mxu1 %v521_v2  ;;  %593 = vmatmul.mubr.f32.vlgmr.msra.gmra.mxu0 %v384_v56  ;;  %v491_v39 = vld [vmem:[#allocation8 + $0x338] sm:$0xff]  ;;  %v458_v42 = vld [vmem:[#allocation8 + $0x230] sm:$0xff]  ;;  %v505_v45 = vld [vmem:[#allocation8 + $0x3a8] sm:$0xff] }
  0xd0   : > { %663 = vmatmul.mubr.f32.vlgmr.msra.gmra.mxu1 %v385_v59  ;;  %1259 = vmatprep.subr.mxu0 %v483_v4  ;;  %v490_v43 = vld [vmem:[#allocation8 + $0x330] sm:$0xff]  ;;  %v457_v46 = vld [vmem:[#allocation8 + $0x228] sm:$0xff]  ;;  %v472_v48 = vld [vmem:[#allocation8 + $0x2a0] sm:$0xff] }
  0xd1   : > { %1294 = vmatprep.subr.mxu1 %v515_v5  ;;  %1260 = vmatpush3.msra.mxu0 %v467_v6  ;;  %v489_v47 = vld [vmem:[#allocation8 + $0x328] sm:$0xff]  ;;  %v504_v49 = vld [vmem:[#allocation8 + $0x3a0] sm:$0xff]  ;;  %v471_v52 = vld [vmem:[#allocation8 + $0x298] sm:$0xff] }
  0xd2   : > { %1295 = vmatpush3.msra.mxu1 %v499_v7  ;;  %1261 = vmatprep.subr.mxu0 %v482_v8  ;;  %v456_v50 = vld [vmem:[#allocation8 + $0x220] sm:$0xff]  ;;  %v503_v53 = vld [vmem:[#allocation8 + $0x398] sm:$0xff]  ;;  %v470_v57 = vld [vmem:[#allocation8 + $0x290] sm:$0xff] }
  0xd3   : > { %1296 = vmatprep.subr.mxu1 %v514_v9  ;;  %1262 = vmatpush3.msra.mxu0 %v466_v10  ;;  %v488_v51 = vld [vmem:[#allocation8 + $0x320] sm:$0xff]  ;;  %v455_v54 = vld [vmem:[#allocation8 + $0x218] sm:$0xff]  ;;  %v502_v58 = vld [vmem:[#allocation8 + $0x390] sm:$0xff] }
  0xd4   : > { %1297 = vmatpush3.msra.mxu1 %v498_v11  ;;  %1263 = vmatprep.subr.mxu0 %v481_v12  ;;  %v487_v55 = vld [vmem:[#allocation8 + $0x318] sm:$0xff]  ;;  %v454_v59 = vld [vmem:[#allocation8 + $0x210] sm:$0xff]  ;;  %v469_v61 = vld [vmem:[#allocation8 + $0x288] sm:$0xff] }
  0xd5   : > { %1298 = vmatprep.subr.mxu1 %v513_v13  ;;  %1264 = vmatpush3.msra.mxu0 %v465_v14  ;;  %v386_v56 = vld [vmem:[%s1976_s20 + $0x10] sm:$0xff]  ;;  %v486_v60 = vld [vmem:[#allocation8 + $0x310] sm:$0xff]  ;;  %v501_v62 = vld [vmem:[#allocation8 + $0x388] sm:$0xff] }
  0xd6   : > { %1299 = vmatpush3.msra.mxu1 %v497_v15  ;;  %1265 = vmatprep.subr.mxu0 %v480_v16  ;;  %v522_v63 = vcombine.high %v386_v56, %v386_v56  ;;  %v453_v0 = vld [vmem:[#allocation8 + $0x208] sm:$0xff]  ;;  %v387_v1 = vld [vmem:[%s1976_s20 + $0x18] sm:$0xff]  ;;  %v842_v6 = vld [vmem:[#allocation10 + $0xf8] sm:$0xff]  ;;  %v1740_v15 = vmov 0.0  }
  0xd7   : > { %1300 = vmatprep.subr.mxu1 %v512_v17  ;;  %1266 = vmatpush3.msra.mxu0 %v464_v18  ;;  %v468_v2 = vld [vmem:[#allocation8 + $0x280] sm:$0xff]  ;;  %v485_v3 = vld [vmem:[#allocation8 + $0x308] sm:$0xff]  ;;  %v523_v7 = vcombine.high %v387_v1, %v387_v1  ;;  %v826_v9 = vld [vmem:[#allocation10 + $0x78] sm:$0xff] }
  0xd8   : > { %1301 = vmatpush3.msra.mxu1 %v496_v19  ;;  %1267 = vmatprep.subr.mxu0 %v479_v20  ;;  %v452_v4 = vld [vmem:[#allocation8 + $0x200] sm:$0xff]  ;;  %v841_v10 = vld [vmem:[#allocation10 + $0xf0] sm:$0xff]  ;;  %v926_v12 = vld [vmem:[#allocation11 + $0x38] sm:$0xff] }
  0xd9   : > { %1302 = vmatprep.subr.mxu1 %v511_v21  ;;  %1268 = vmatpush3.msra.mxu0 %v463_v22  ;;  %v500_v5 = vld [vmem:[#allocation8 + $0x380] sm:$0xff]  ;;  %v825_v11 = vld [vmem:[#allocation10 + $0x70] sm:$0xff]  ;;  %v840_v13 = vld [vmem:[#allocation10 + $0xe8] sm:$0xff] }
  0xda   : > { %1303 = vmatpush3.msra.mxu1 %v495_v23  ;;  %1269 = vmatprep.subr.mxu0 %v478_v24  ;;  %v484_v8 = vld [vmem:[#allocation8 + $0x300] sm:$0xff]  ;;  %v824_v14 = vld [vmem:[#allocation10 + $0x68] sm:$0xff]  ;;  %v925_v16 = vld [vmem:[#allocation11 + $0x30] sm:$0xff] }
  0xdb   : > { %1304 = vmatprep.subr.mxu1 %v510_v25  ;;  %1270 = vmatpush3.msra.mxu0 %v462_v26  ;;  %v839_v17 = vld [vmem:[#allocation10 + $0xe0] sm:$0xff]  ;;  %v924_v19 = vld [vmem:[#allocation11 + $0x28] sm:$0xff]  ;;  %v838_v20 = vld [vmem:[#allocation10 + $0xd8] sm:$0xff] }
  0xdc   : > { %1305 = vmatpush3.msra.mxu1 %v494_v27  ;;  %1271 = vmatprep.subr.mxu0 %v477_v28  ;;  %v823_v18 = vld [vmem:[#allocation10 + $0x60] sm:$0xff]  ;;  %v822_v21 = vld [vmem:[#allocation10 + $0x58] sm:$0xff]  ;;  %v837_v23 = vld [vmem:[#allocation10 + $0xd0] sm:$0xff] }
  0xdd   : > { %1306 = vmatprep.subr.mxu1 %v509_v29  ;;  %1272 = vmatpush3.msra.mxu0 %v461_v30  ;;  %v923_v22 = vld [vmem:[#allocation11 + $0x20] sm:$0xff]  ;;  %v821_v24 = vld [vmem:[#allocation10 + $0x50] sm:$0xff]  ;;  %v922_v25 = vld [vmem:[#allocation11 + $0x18] sm:$0xff] }
  0xde   : > { %1307 = vmatpush3.msra.mxu1 %v493_v31  ;;  %1273 = vmatprep.subr.mxu0 %v476_v32  ;;  %v810_v26 = vld [vmem:[%s1984_s10] sm:$0xff]  ;;  %v835_v30 = vld [vmem:[#allocation10 + $0xc0] sm:$0xff] }
  0xdf   : > { %1308 = vmatprep.subr.mxu1 %v508_v33  ;;  %1274 = vmatpush3.msra.mxu0 %v460_v34  ;;  %v836_v27 = vld [vmem:[#allocation10 + $0xc8] sm:$0xff]  ;;  %v921_v29 = vld [vmem:[#allocation11 + $0x10] sm:$0xff]  ;;  %v844_v31 = vcombine.high %v810_v26, %v810_v26  ;;  %v819_v32 = vld [vmem:[#allocation10 + $0x40] sm:$0xff] }
  0xe0   : > { %1309 = vmatpush3.msra.mxu1 %v492_v35  ;;  %1275 = vmatprep.subr.mxu0 %v475_v36  ;;  %v820_v28 = vld [vmem:[#allocation10 + $0x48] sm:$0xff]  ;;  %v834_v33 = vld [vmem:[#allocation10 + $0xb8] sm:$0xff]  ;;  %v833_v36 = vld [vmem:[#allocation10 + $0xb0] sm:$0xff] }
  0xe1   : > { %1310 = vmatprep.subr.mxu1 %v507_v37  ;;  %1276 = vmatpush3.msra.mxu0 %v459_v38  ;;  %v920_v34 = vld [vmem:[#allocation11 + $0x8] sm:$0xff]  ;;  %v818_v35 = vld [vmem:[#allocation10 + $0x38] sm:$0xff]  ;;  %v919_v37 = vld [vmem:[#allocation11] sm:$0xff] }
  0xe2   : > { %1311 = vmatpush3.msra.mxu1 %v491_v39  ;;  %1277 = vmatprep.subr.mxu0 %v474_v40  ;;  %v817_v38 = vld [vmem:[#allocation10 + $0x30] sm:$0xff]  ;;  %v832_v39 = vld [vmem:[#allocation10 + $0xa8] sm:$0xff]  ;;  %v918_v40 = vld [vmem:[%s1991_s9] sm:$0xf] }
  0xe3   : > { %1312 = vmatprep.subr.mxu1 %v506_v41  ;;  %1278 = vmatpush3.msra.mxu0 %v458_v42  ;;  %v816_v41 = vld [vmem:[#allocation10 + $0x28] sm:$0xff]  ;;  %v831_v42 = vld [vmem:[#allocation10 + $0xa0] sm:$0xff] }
  0xe4   : > { %1313 = vmatpush3.msra.mxu1 %v490_v43  ;;  %1279 = vmatprep.subr.mxu0 %v473_v44  ;;  %v815_v43 = vld [vmem:[#allocation10 + $0x20] sm:$0xff]  ;;  %v830_v44 = vld [vmem:[#allocation10 + $0x98] sm:$0xff] }
  0xe5   : > { %1314 = vmatprep.subr.mxu1 %v505_v45  ;;  %1280 = vmatpush3.msra.mxu0 %v457_v46  ;;  %v814_v45 = vld [vmem:[#allocation10 + $0x18] sm:$0xff]  ;;  %v829_v46 = vld [vmem:[#allocation10 + $0x90] sm:$0xff] }
  0xe6   : > { %1315 = vmatpush3.msra.mxu1 %v489_v47  ;;  %1281 = vmatprep.subr.mxu0 %v472_v48  ;;  %v813_v47 = vld [vmem:[#allocation10 + $0x10] sm:$0xff]  ;;  %v828_v48 = vld [vmem:[#allocation10 + $0x88] sm:$0xff] }
  0xe7   : > { %1316 = vmatprep.subr.mxu1 %v504_v49  ;;  %1282 = vmatpush3.msra.mxu0 %v456_v50  ;;  %v812_v49 = vld [vmem:[#allocation10 + $0x8] sm:$0xff]  ;;  %v827_v50 = vld [vmem:[#allocation10 + $0x80] sm:$0xff] }
  0xe8   : > { %1317 = vmatpush3.msra.mxu1 %v488_v51  ;;  %1283 = vmatprep.subr.mxu0 %v471_v52  ;;  %v811_v51 = vld [vmem:[#allocation10] sm:$0xff] }
  0xe9   : > { %1318 = vmatprep.subr.mxu1 %v503_v53  ;;  %1284 = vmatpush3.msra.mxu0 %v455_v54 }
  0xea   : > { %1319 = vmatpush3.msra.mxu1 %v487_v55  ;;  %1285 = vmatprep.subr.mxu0 %v470_v57 }
  0xeb   : > { %1320 = vmatprep.subr.mxu1 %v502_v58  ;;  %1286 = vmatpush3.msra.mxu0 %v454_v59 }
  0xec   : > { %1321 = vmatpush3.msra.mxu1 %v486_v60  ;;  %1287 = vmatprep.subr.mxu0 %v469_v61 }
  0xed   : > { %1322 = vmatprep.subr.mxu1 %v501_v62  ;;  %1288 = vmatpush3.msra.mxu0 %v453_v0 }
  0xee   : > { %732 = vmatprep.mubr.f32.mxu0 %v522_v63  ;;  %1289 = vmatprep.subr.mxu0 %v468_v2 }
  0xef   : > { %1323 = vmatpush3.msra.mxu1 %v485_v3  ;;  %1290 = vmatpush3.msra.mxu0 %v452_v4 }
  0xf0   : > { %1324 = vmatprep.subr.mxu1 %v500_v5  ;;  %733 = vmatmul.mubr.f32.vlgmr.msra.gmra.mxu0 %v386_v56 }
  0xf1   : > { %1329 = vmatprep.subr.mxu0 %v842_v6  ;;  %1325 = vmatpush3.msra.mxu1 %v484_v8 }
  0xf2   : > { %802 = vmatprep.mubr.f32.mxu1 %v523_v7  ;;  %1330 = vmatpush3.msra.mxu0 %v826_v9 }
  0xf3   : > { %803 = vmatmul.mubr.f32.vlgmr.msra.gmra.mxu1 %v387_v1  ;;  %1331 = vmatprep.subr.mxu0 %v841_v10 }
  0xf4   : > { %1373 = vmatprep.subr.mxu1 %v1740_v15  ;;  %1332 = vmatpush3.msra.mxu0 %v825_v11 }
  0xf5   : > { %1374 = vmatpush3.msra.mxu1 %v926_v12  ;;  %1333 = vmatprep.subr.mxu0 %v840_v13 }
  0xf6   : > { %1375 = vmatprep.subr.mxu1 %v1740_v15  ;;  %1334 = vmatpush3.msra.mxu0 %v824_v14 }
  0xf7   : > { %1376 = vmatpush3.msra.mxu1 %v925_v16  ;;  %1335 = vmatprep.subr.mxu0 %v839_v17 }
  0xf8   : > { %1377 = vmatprep.subr.mxu1 %v1740_v15  ;;  %1336 = vmatpush3.msra.mxu0 %v823_v18 }
  0xf9   : > { %1378 = vmatpush3.msra.mxu1 %v924_v19  ;;  %1337 = vmatprep.subr.mxu0 %v838_v20 }
  0xfa   : > { %1379 = vmatprep.subr.mxu1 %v1740_v15  ;;  %1338 = vmatpush3.msra.mxu0 %v822_v21 }
  0xfb   : > { %1380 = vmatpush3.msra.mxu1 %v923_v22  ;;  %1339 = vmatprep.subr.mxu0 %v837_v23 }
  0xfc   : > { %1381 = vmatprep.subr.mxu1 %v1740_v15  ;;  %1340 = vmatpush3.msra.mxu0 %v821_v24 }
  0xfd   : > { %1382 = vmatpush3.msra.mxu1 %v922_v25  ;;  %1341 = vmatprep.subr.mxu0 %v836_v27 }
  0xfe   : > { %1383 = vmatprep.subr.mxu1 %v1740_v15  ;;  %1342 = vmatpush3.msra.mxu0 %v820_v28 }
  0xff   : > { %1384 = vmatpush3.msra.mxu1 %v921_v29  ;;  %1343 = vmatprep.subr.mxu0 %v835_v30 }
 0x100   : > { %1385 = vmatprep.subr.mxu1 %v1740_v15  ;;  %1344 = vmatpush3.msra.mxu0 %v819_v32 }
 0x101   : > { %910 = vmatprep.mubr.f32.mxu0 %v844_v31  ;;  %1345 = vmatprep.subr.mxu0 %v834_v33 }
 0x102   : > { %1386 = vmatpush3.msra.mxu1 %v920_v34  ;;  %1346 = vmatpush3.msra.mxu0 %v818_v35 }
 0x103   : > { %1387 = vmatprep.subr.mxu1 %v1740_v15  ;;  %1347 = vmatprep.subr.mxu0 %v833_v36 }
 0x104   : > { %1388 = vmatpush3.msra.mxu1 %v919_v37  ;;  %1348 = vmatpush3.msra.mxu0 %v817_v38 }
 0x105   : > { %1389 = vmatprep.mubr.msk.f32.mxu1 %vm1741_vm1, %v1740_v15  ;;  %1349 = vmatprep.subr.mxu0 %v832_v39 }
 0x106   : > { %1390 = vmatmul.mubr.msk.f32.vlgmr.msra.gmra.mxu1 %vm927_vm0, %v918_v40  ;;  %1350 = vmatpush3.msra.mxu0 %v816_v41 }
 0x107   : > { %1351 = vmatprep.subr.mxu0 %v831_v42 }
 0x108   : > { %1352 = vmatpush3.msra.mxu0 %v815_v43 }
 0x109   : > { %1353 = vmatprep.subr.mxu0 %v830_v44 }
 0x10a   : > { %1354 = vmatpush3.msra.mxu0 %v814_v45 }
 0x10b   : > { %1355 = vmatprep.subr.mxu0 %v829_v46 }
 0x10c   : > { %1356 = vmatpush3.msra.mxu0 %v813_v47 }
 0x10d   : > { %1357 = vmatprep.subr.mxu0 %v828_v48 }
 0x10e   : > { %1358 = vmatpush3.msra.mxu0 %v812_v49 }
 0x10f   : > { %1359 = vmatprep.subr.mxu0 %v827_v50 }
 0x110   : > { %1360 = vmatpush3.msra.mxu0 %v811_v51 }
 0x111   : > { %911 = vmatmul.mubr.f32.vlgmr.msra.gmra.mxu0 %v810_v26 }
 0x18f   : > { %v1221_v52 = vpop.f32.mrf.mxu0 }
 0x190   : > { %v1256_v53 = vpop.f32.mrf.mxu1 }
 0x191   : > { %v1222_v54 = vpop.f32.mrf.mxu0 }
 0x192   : > { %v1257_v55 = vpop.f32.mrf.mxu1  ;;  %v1223_v56 = vadd.f32 %v1222_v54, %v1221_v52 }
 0x193   : > { %v1258_v57 = vadd.f32 %v1257_v55, %v1256_v53 }
 0x195   : > { %v665_v61 = vadd.f32 %v1258_v57, %v1223_v56 }
 0x1b0   : > { %v1291_v58 = vpop.f32.mrf.mxu0 }
 0x1b2   : > { %v1292_v59 = vpop.f32.mrf.mxu0 }
 0x1b3   : > { %v1326_v60 = vpop.f32.mrf.mxu1  ;;  %v1293_v62 = vadd.f32 %v1292_v59, %v1291_v58 }
 0x1b5   : > { %v1327_v63 = vpop.f32.mrf.mxu1  ;;  %v735_v0 = vadd.f32 %v1293_v62, %v665_v61 }
 0x1b6   : > { %v1328_v1 = vadd.f32 %v1327_v63, %v1326_v60 }
 0x1b8   : > { %v805_v2 = vadd.f32 %v1328_v1, %v735_v0 }
 0x1ba   : > { %v808_v3 = vmul.f32 0.015625, %v805_v2 }
 0x1bc   : > { %809 = vst [vmem:[%s383_s11] sm:$0xf] %v808_v3 }
 0x1c6   : > { %v997_v4 = vpop.f32.mrf.mxu1 }
 0x1c7   : > { %v1001_v5 = vmul.f32 0.25, %v997_v4 }
 0x1c8   : > { %v1391_v6 = vpop.f32.mrf.mxu1 }
 0x1c9   : > { %1002 = vst [vmem:[%s383_s11 + $0x10] sm:$0xf] %v1001_v5 }
 0x1d1   : > { %v1361_v7 = vpop.f32.mrf.mxu0 }
 0x1d3   : > { %v1362_v8 = vpop.f32.mrf.mxu0 }
 0x1d4   : > { %v1363_v9 = vadd.f32 %v1362_v8, %v1361_v7 }
 0x1d6   : > { %v916_v10 = vmul.f32 0.0625, %v1363_v9 }
 0x1d8   : > { %917 = vst [vmem:[%s383_s11 + $0x8] sm:$0xf] %v916_v10 }
 0x1d9   : > { %1667 = shalt.err (!%p1664_p11)
}
 0x1da   : > { %s1668_s1 = scalar_lea.hbm %s2023_s8, 384  ;;  %s1672_s29 = scalar_lea.hbm %s2072_s6, 768 }
 0x1db   : > { %p1669_p5 = scmp.ne.s32.totalorder %s2023_s8, %s1668_s1  ;;  %p1673_p2 = scmp.lt.s32.totalorder %s2023_s8, %s2072_s6 }
 0x1dc   : > { %p1674_p13 = scmp.lt.s32.totalorder %s1672_s29, %s1668_s1 }
 0x1dd   : > { %p1670_p10 = pnand %p1669_p5, %p2114_p7 }
 0x1de   : > { %p1675_p1 = por %p1674_p13, %p1673_p2 }
 0x1df   : > { %p1671_p9 = pneg %p1670_p10 }
 0x1e1   : > { %p1676_p12 = pnand %p1675_p1, %p1671_p9 }
 0x1e3   : > { %1679 = shalt.err (!%p1676_p12)
}
 0x1e4   : > { %s1743_s10 = smov 128   ;;  %s1744_s23 = smov 8  }
 0x1e5   : > { %1412 = dma.vmem_to_hbm [thread:$0]  (%p2114_p7), %s2018_s7, 384, %s2023_s8, %s1004_s17, %s1743_s10, %s1743_s10, %s1744_s23  }
 0x1e6 PF: > { %s1032_s9 = sand.u32 1, %s1718_s21   ;;  %p2115_p0 = scmp.ne.s32.totalorder %s2092_s28, 0 }
 0x1e7   : > { %p2116_p3 = scmp.ge.s32.totalorder %s1730_s24, 2  ;;  %s1033_s27 = scalar_lea.sflag [#allocation4], %s1032_s9 }
 0x1e9   : > { %p1435_p4 = pnand %p2116_p3, %p2115_p0 }
 0x1eb   : > { %p1436_p8 = pneg %p1435_p4 }
 0x1ed   : > { %1713 = dma.done.wait (%p1436_p8), %s1033_s27, 384  }
 0x1ee   : > { %1715 = vsyncadd (%p1436_p8), %s1033_s27, 4294966912  ;;  %s2117_s24 = sld [smem:[#allocation20_spill]]  ;;  %s2120_s21 = smov %s1722_s22 }
 0x1ef   : > { %s2118_s11 = sld [smem:[#allocation19_spill]] }
 0x1f0   : > { %s2119_s23 = sld [smem:[#allocation21_spill]] }
 0x1f4   : > { %p24_p6 = scmp.ge.s32.totalorder %s2117_s24, 4  }
 0x1f5   : > { %s2121_s22 = smov %s2118_s11 }
 0x1f6   :  { %26 = sbr.rel (!%p24_p6) target bundleno = 13 (0xd), region = 125 }
 0x1fb   :  { %1038 = vsyncpa [#allocation3], 1 }
 0x1fc   :  { %1040 = vsyncpa [#allocation3 + $0x1], 1 }
 0x1fd   :  { %1041 = vsyncpa [#allocation6], 1 }
 0x1fe   :  { %1043 = vsyncpa [#allocation6 + $0x1], 1 }
 0x1ff   :  { %1044 = vsyncpa [#allocation9], 1 }
 0x200   :  { %1045 = vsyncpa [#allocation12], 1 }
 0x201   :  { %1046 = vsyncpa [#allocation4], 1 }
 0x202   :  { %1048 = vsyncpa [#allocation4 + $0x1], 1 }

</bundles_post_ra>
